<compile_context>
chip_gen: v7x
topology: tpu7x:2x2x1
jax: 0.10.0
libtpu: 0.0.40
codegen_flags: <defaults>
</compile_context>

<pallas_src>
import jax
import jax.numpy as jnp
from jax.experimental import pallas as pl
from jax.experimental.pallas import tpu as pltpu


def _silu(x):
    return x * jax.nn.sigmoid(x)


def _point_mlp_kernel(x_ref, eb_ref, w1t_ref, w2t_ref, b2_ref, o_ref):
    """One (batch, point-tile) step of the conditioned point-cloud MLP.

      x_ref  : [Cin,  TILE_N] bf16  point slab (points lane-dense)
      eb_ref : [H, 1]         f32   cond embedding + layer-1 bias (per batch)
      w1t_ref: [H, Cin]       bf16  layer-1 weights^T (resident)
      w2t_ref: [Cout, H]      bf16  layer-2 weights^T (resident)
      b2_ref : [Cout, 1]      f32   layer-2 bias (resident)
      o_ref  : [Cout, TILE_N] bf16
    """
    x = x_ref[...]                                                     # bf16

    # Layer 1 on the MXU (K=Cin is tiny and wastes MXU FLOPs, but the MXU slot
    # is otherwise idle here; this moves ~24 VPU ops/lane-group off the VALU).
    h = jnp.dot(w1t_ref[...], x, preferred_element_type=jnp.float32)   # [H, TILE_N] f32

    # Bias + condition embedding folded into one broadcast add, then SiLU with
    # both transcendentals (exp, reciprocal) on the EUP slot.
    h = h + eb_ref[...]
    h = h * pl.reciprocal(1.0 + jnp.exp(-h), approx=True)

    # Layer 2 on the MXU: bf16 operands (v7x fast path), f32 accumulation.
    o = jnp.dot(w2t_ref[...], h.astype(w2t_ref.dtype),
                preferred_element_type=jnp.float32)                    # [Cout, TILE_N]
    o = o + b2_ref[...]
    o_ref[...] = o.astype(o_ref.dtype)


def model_wrapper_forward(dat, cond, params, *, tile_n=4096):
    """Conditioned point-cloud MLP (the ModelWrapper forward hot path).

    dat : [B, Cin, N] channel-major point cloud (bf16 or f32)
    cond: [B, Dc]     f32 condition vector
    ->    [B, Cout, N] bf16
    """
    B, Cin, N = dat.shape
    H = params["w1"].shape[1]
    Cout = params["w2"].shape[1]

    # Pick the point tile: large (amortize per-step overhead), lane-dense, and
    # non-degenerate so v7x's 2 TensorCores both get grid steps.
    tile_n = min(tile_n, N)
    assert tile_n % 128 == 0, "point tile must be lane-dense (multiple of 128)"
    assert N % tile_n == 0, "N must be a multiple of tile_n (pad in the caller)"
    n_tiles = N // tile_n
    while B * n_tiles < 2 and tile_n % 256 == 0:
        tile_n //= 2
        n_tiles = N // tile_n

    # --- condition_model hoisted out of the kernel (tiny [B, H] MLP) ---
    e = _silu(cond @ params["wc1"] + params["bc1"])
    e = e @ params["wc2"] + params["bc2"]                       # [B, H]
    # Fold the pointcloud layer-1 bias in here -> single add inside the kernel.
    eb = (e + params["b1"])[..., None].astype(jnp.float32)      # [B, H, 1]

    # --- resident weights: transposed (tiny), bf16 with f32 accumulation ---
    w1t = jnp.transpose(params["w1"]).astype(jnp.bfloat16)      # [H, Cin]
    w2t = jnp.transpose(params["w2"]).astype(jnp.bfloat16)      # [Cout, H]
    b2 = params["b2"].reshape(Cout, 1).astype(jnp.float32)      # [Cout, 1]
    dat_b = dat.astype(jnp.bfloat16)                            # no-op if already bf16

    full = lambda shape: pl.BlockSpec(shape, lambda b, n: tuple(0 for _ in shape))

    out = pl.pallas_call(
        _point_mlp_kernel,
        out_shape=jax.ShapeDtypeStruct((B, Cout, N), jnp.bfloat16),
        grid=(B, n_tiles),   # batch outer -> eb / weight blocks stay resident over n
        in_specs=[
            pl.BlockSpec((None, Cin, tile_n), lambda b, n: (b, 0, n)),   # dat tile
            pl.BlockSpec((None, H, 1), lambda b, n: (b, 0, 0)),          # emb + b1
            full((H, Cin)),                                              # w1^T
            full((Cout, H)),                                             # w2^T
            full((Cout, 1)),                                             # b2
        ],
        out_specs=pl.BlockSpec((None, Cout, tile_n), lambda b, n: (b, 0, n)),
        compiler_params=pltpu.CompilerParams(
            dimension_semantics=("parallel", "parallel"),
            vmem_limit_bytes=32 * 1024 * 1024,
        ),
    )(dat_b, eb, w1t, w2t, b2)

    return out                                                  # [B, Cout, N] bf16


def _reference(dat, cond, params):
    """Pure-JAX f32 reference in the same channel-major layout."""
    e = _silu(cond @ params["wc1"] + params["bc1"])
    e = e @ params["wc2"] + params["bc2"]                       # [B, H]
    x = dat.astype(jnp.float32)                                 # [B, Cin, N]
    h = jnp.einsum("hc,bcn->bhn", params["w1"].T, x) + params["b1"].reshape(1, -1, 1)
    h = _silu(h + e[:, :, None])
    o = jnp.einsum("oh,bhn->bon", params["w2"].T, h) + params["b2"].reshape(1, -1, 1)
    return o


if __name__ == "__main__":
    B, N, Cin, Cout, Dc, H = 2, 1024, 3, 3, 16, 32

    key = jax.random.PRNGKey(0)
    ks = jax.random.split(key, 10)

    # Point tensors kept channel-major ([B, C, N]) and bf16 end-to-end, so the
    # wrapper does no transpose / downcast HBM passes around the kernel.
    dat = jax.random.normal(ks[0], (B, Cin, N), jnp.float32).astype(jnp.bfloat16)
    cond = jax.random.normal(ks[1], (B, Dc), jnp.float32)

    params = {
        "wc1": jax.random.normal(ks[2], (Dc, H), jnp.float32) * 0.1,
        "bc1": jax.random.normal(ks[6], (1, H), jnp.float32) * 0.1,
        "wc2": jax.random.normal(ks[3], (H, H), jnp.float32) * 0.1,
        "bc2": jax.random.normal(ks[7], (1, H), jnp.float32) * 0.1,
        "w1":  jax.random.normal(ks[4], (Cin, H), jnp.float32) * 0.1,
        "b1":  jax.random.normal(ks[8], (1, H), jnp.float32) * 0.1,
        "w2":  jax.random.normal(ks[5], (H, Cout), jnp.float32) * 0.1,
        "b2":  jax.random.normal(ks[9], (1, Cout), jnp.float32) * 0.1,
    }

    out = model_wrapper_forward(dat, cond, params, tile_n=4096)
    out = jax.block_until_ready(out)

    ref = _reference(dat, cond, params)
    assert out.shape == (B, Cout, N)
    err = float(jnp.max(jnp.abs(out.astype(jnp.float32) - ref)))
    # bf16 I/O + bf16 MXU operands + approx reciprocal -> loosened tolerance.
    assert err < 2e-2, f"max abs error {err}"

    print("KERNEL_OK")
</pallas_src>

<mosaic_0001>
module attributes {stable_mosaic.version = 11 : i64} {
  func.func @_point_mlp_kernel(%arg0: i32, %arg1: i32, %arg2: memref<1x3x1024xbf16, #tpu.memory_space<vmem>>, %arg3: memref<1x32x1xf32, #tpu.memory_space<vmem>>, %arg4: memref<32x3xbf16, #tpu.memory_space<vmem>>, %arg5: memref<3x32xbf16, #tpu.memory_space<vmem>>, %arg6: memref<3x1xf32, #tpu.memory_space<vmem>>, %arg7: memref<1x3x1024xbf16, #tpu.memory_space<vmem>>) attributes {dimension_semantics = [#tpu.dimension_semantics<parallel>, #tpu.dimension_semantics<parallel>], iteration_bounds = array<i64: 2, 1>, scalar_prefetch = 0 : i64, scratch_operands = 0 : i64, tpu.core_type = #tpu.core_type<tc>, window_params = [{transform_indices = @transform_0, window_bounds = array<i64: 1, 3, 1024>}, {transform_indices = @transform_1, window_bounds = array<i64: 1, 32, 1>}, {pipeline_mode = #tpu.pipeline_mode<synchronous>, transform_indices = @transform_2, window_bounds = array<i64: 32, 3>}, {pipeline_mode = #tpu.pipeline_mode<synchronous>, transform_indices = @transform_3, window_bounds = array<i64: 3, 32>}, {pipeline_mode = #tpu.pipeline_mode<synchronous>, transform_indices = @transform_4, window_bounds = array<i64: 3, 1>}, {transform_indices = @transform_5, window_bounds = array<i64: 1, 3, 1024>}]} {
    %c0 = arith.constant 0 : index
    %c0_0 = arith.constant 0 : index
    %c0_1 = arith.constant 0 : index
    %0 = vector.load %arg2[%c0, %c0_0, %c0_1] : memref<1x3x1024xbf16, #tpu.memory_space<vmem>>, vector<1x3x1024xbf16>
    %1 = vector.shape_cast %0 : vector<1x3x1024xbf16> to vector<3x1024xbf16>
    %c0_2 = arith.constant 0 : index
    %c0_3 = arith.constant 0 : index
    %2 = vector.load %arg4[%c0_2, %c0_3] : memref<32x3xbf16, #tpu.memory_space<vmem>>, vector<32x3xbf16>
    %cst = arith.constant dense<0.000000e+00> : vector<32x1024xf32>
    %3 = tpu.matmul %2, %1, %cst {dimension_numbers = #tpu.dot_dimension_numbers<[1], [0], [0], [1], [0, 0, 1, 1], [], []>} : vector<32x3xbf16>, vector<3x1024xbf16>, vector<32x1024xf32> -> vector<32x1024xf32>
    %c0_4 = arith.constant 0 : index
    %c0_5 = arith.constant 0 : index
    %c0_6 = arith.constant 0 : index
    %4 = vector.load %arg3[%c0_4, %c0_5, %c0_6] : memref<1x32x1xf32, #tpu.memory_space<vmem>>, vector<1x32x1xf32>
    %5 = vector.shape_cast %4 : vector<1x32x1xf32> to vector<32x1xf32>
    %6 = vector.broadcast %5 : vector<32x1xf32> to vector<32x1024xf32>
    %7 = arith.addf %3, %6 : vector<32x1024xf32>
    %cst_7 = arith.constant 0.000000e+00 : f32
    %8 = vector.broadcast %cst_7 : f32 to vector<32x1024xf32>
    %9 = arith.subf %8, %7 : vector<32x1024xf32>
    %10 = math.exp %9 : vector<32x1024xf32>
    %cst_8 = arith.constant 1.000000e+00 : f32
    %11 = vector.broadcast %cst_8 : f32 to vector<32x1024xf32>
    %12 = arith.addf %11, %10 : vector<32x1024xf32>
    %13 = tpu.reciprocal %12 {approx = true} : vector<32x1024xf32> -> vector<32x1024xf32>
    %14 = arith.mulf %7, %13 : vector<32x1024xf32>
    %c0_9 = arith.constant 0 : index
    %c0_10 = arith.constant 0 : index
    %15 = vector.load %arg5[%c0_9, %c0_10] : memref<3x32xbf16, #tpu.memory_space<vmem>>, vector<3x32xbf16>
    %16 = arith.truncf %14 : vector<32x1024xf32> to vector<32x1024xbf16>
    %cst_11 = arith.constant dense<0.000000e+00> : vector<3x1024xf32>
    %17 = tpu.matmul %15, %16, %cst_11 {dimension_numbers = #tpu.dot_dimension_numbers<[1], [0], [0], [1], [0, 0, 1, 1], [], []>} : vector<3x32xbf16>, vector<32x1024xbf16>, vector<3x1024xf32> -> vector<3x1024xf32>
    %c0_12 = arith.constant 0 : index
    %c0_13 = arith.constant 0 : index
    %18 = vector.load %arg6[%c0_12, %c0_13] : memref<3x1xf32, #tpu.memory_space<vmem>>, vector<3x1xf32>
    %19 = vector.broadcast %18 : vector<3x1xf32> to vector<3x1024xf32>
    %20 = arith.addf %17, %19 : vector<3x1024xf32>
    %21 = arith.truncf %20 : vector<3x1024xf32> to vector<3x1024xbf16>
    %c0_14 = arith.constant 0 : index
    %c0_15 = arith.constant 0 : index
    %c0_16 = arith.constant 0 : index
    %22 = vector.load %arg7[%c0_14, %c0_15, %c0_16] : memref<1x3x1024xbf16, #tpu.memory_space<vmem>>, vector<1x3x1024xbf16>
    %23 = vector.shape_cast %22 : vector<1x3x1024xbf16> to vector<3x1024xbf16>
    %24 = vector.shape_cast %21 : vector<3x1024xbf16> to vector<1x3x1024xbf16>
    tpu.vector_store %arg7[%c0_14, %c0_15, %c0_16], %24 {strides = array<i32>} : memref<1x3x1024xbf16, #tpu.memory_space<vmem>>, vector<1x3x1024xbf16>,
    return
  }
  func.func @transform_0(%arg0: i32, %arg1: i32) -> (i32, i32, i32) {
    %c0_i32 = arith.constant 0 : i32
    %c0_i32_0 = arith.constant 0 : i32
    return %arg0, %c0_i32, %arg1 : i32, i32, i32
  }
  func.func @transform_1(%arg0: i32, %arg1: i32) -> (i32, i32, i32) {
    %c0_i32 = arith.constant 0 : i32
    %c0_i32_0 = arith.constant 0 : i32
    %c0_i32_1 = arith.constant 0 : i32
    return %arg0, %c0_i32, %c0_i32_0 : i32, i32, i32
  }
  func.func @transform_2(%arg0: i32, %arg1: i32) -> (i32, i32) {
    %c0_i32 = arith.constant 0 : i32
    %c0_i32_0 = arith.constant 0 : i32
    %c0_i32_1 = arith.constant 0 : i32
    return %c0_i32, %c0_i32_0 : i32, i32
  }
  func.func @transform_3(%arg0: i32, %arg1: i32) -> (i32, i32) {
    %c0_i32 = arith.constant 0 : i32
    %c0_i32_0 = arith.constant 0 : i32
    %c0_i32_1 = arith.constant 0 : i32
    return %c0_i32, %c0_i32_0 : i32, i32
  }
  func.func @transform_4(%arg0: i32, %arg1: i32) -> (i32, i32) {
    %c0_i32 = arith.constant 0 : i32
    %c0_i32_0 = arith.constant 0 : i32
    %c0_i32_1 = arith.constant 0 : i32
    return %c0_i32, %c0_i32_0 : i32, i32
  }
  func.func @transform_5(%arg0: i32, %arg1: i32) -> (i32, i32, i32) {
    %c0_i32 = arith.constant 0 : i32
    %c0_i32_0 = arith.constant 0 : i32
    return %arg0, %c0_i32, %arg1 : i32, i32, i32
  }
}

</mosaic_0001>

<bundles_post_ra>
// kernel: tpu_custom_call.1
= control target key start
LH: loop header
LB: loop body
LE: loop exit
PB: predicated region body
PF: predicated region fallthrough
CT: control target
= control target key end

     0   :  { %s1415_s18 = smov 0   ;;  %s1417_s19 = smov 0   ;;  %s1726_s0 = inlined_call_operand.vmem [shape: bf16[2,3,1024], index: 0, kind: input, shape index: {}]   ;;  %s1727_s1 = inlined_call_operand.vmem [shape: f32[2,32,1], index: 1, kind: input, shape index: {}]   ;;  %s1728_s2 = inlined_call_operand.vmem [shape: bf16[32,3], index: 2, kind: input, shape index: {}]   ;;  %s1729_s3 = inlined_call_operand.vmem [shape: bf16[3,32], index: 3, kind: input, shape index: {}]   ;;  %s1730_s4 = inlined_call_operand.vmem [shape: f32[3,1], index: 4, kind: input, shape index: {}]   ;;  %s1731_s5 = inlined_call_operand.vmem [shape: bf16[2,3,1024], index: 5, kind: output, shape index: {}]  }
   0x1   :  { %s1419_s20 = smov 0  }
   0x2 LB: > { %s27_s21 = sadd.s32 1, %s1376_s19  ;;  %p1167_p0 = scmp.ge.s32.totalorder %s1380_s20, 1  ;;  %s1380_s20 = sphi %s1419_s20, %s15_s20   ;;  %s1376_s19 = sphi %s1417_s19, %s1737_s19   ;;  %s1372_s18 = sphi %s1415_s18, %s1736_s18  }
   0x3   : > { %p29_p1 = scmp.ge.s32.totalorder %s27_s21, 2  ;;  %p218_p2 = scmp.lt.s32.totalorder %s1380_s20, 3 }
   0x5   : > { %s1739_s21 = smov (%p29_p1, %s27_s21), 0  ;;  %p219_p3 = pnand %p1167_p0, %p218_p2 }
   0x6   : > { %p260_p4 = scmp.lt.s32.totalorder (!%p219_p3), %s1372_s18, 1  ;;  %v331_v0 = vlaneseq (!%p219_p3)  ;;  %vm368_vm0 = vcmask (!%p219_p3), 1040384   ;;  %v1382_v1 = vmov (!%p219_p3), 1983009808   ;;  %v1383_v4 = vmov (!%p219_p3), 0   ;;  %v1228_v31 = vld [vmem:[%s1728_s2] sm:$0xff] (!%p219_p3)  }
   0x7   : > { %222 = sbr.rel (%p219_p3) target bundleno = 557 (0x22d), region = 40  ;;  %v329_v2 = vunpack.c.l.s4 (!%p219_p3), %v1382_v1  ;;  %428 = vmatprep.mubr.bf16.mxu0 (!%p219_p3), %v1383_v4  ;;  %481 = vmatprep.mubr.bf16.mxu1 (!%p219_p3), %v1383_v4  ;;  %vm369_vm1 = vcmask (!%p219_p3), 1041408   ;;  %v1384_v6 = vmov (!%p219_p3), 65535   ;;  %v817_v32 = vld [vmem:[%s1730_s4] sm:$0x7] (!%p219_p3)  ;;  %vm361_vm2 = vcmask (!%p219_p3), 23552  }
   0x8   : > { %v332_v3 = vshrl.u32 (!%p219_p3), %v331_v0, 7  ;;  %v370_v7 = vsel (!%p219_p3), %vm368_vm0, 4294967295, %v1384_v6  ;;  %1224 = vset.pattern.permute.xlu0 (!%p219_p3), %v1383_v4  ;;  %1225 = vset.pattern.permute.xlu1 (!%p219_p3), %v1383_v4  ;;  %v1229_v36 = vld [vmem:[%s1728_s2 + $0x8] sm:$0xff] (!%p219_p3)   ;;  %vm823_vm3 = vcmask (!%p219_p3), 261120   ;;  %vm1044_vm4 = vsmask.f32 (!%p219_p3), 1280 }
   0x9   : > { %v330_v5 = vunpack.c.0.s8 (!%p219_p3), %v329_v2  ;;  %v371_v11 = vsel (!%p219_p3), %vm369_vm1, %v370_v7, 0  ;;  %vm1046_vm5 = vcmask (!%p219_p3), 1043458   ;;  %vm1047_vm6 = vsmask.f32 (!%p219_p3), 3328  ;;  %vm1045_vm7 = vmand (!%p219_p3), %vm369_vm1, %vm1044_vm4 }
   0xa   : > { %vm1048_vm8 = vmand (!%p219_p3), %vm1046_vm5, %vm1047_vm6  ;;  %vm1050_vm9 = vcmask (!%p219_p3), 1045508   ;;  %vm1051_vm10 = vsmask.f32 (!%p219_p3), 5376  ;;  %vm1054_vm13 = vcmask (!%p219_p3), 1047558   ;;  %vm1055_vm14 = vsmask.f32 (!%p219_p3), 7424 }
   0xb   : > { %v1446_v8 = vsub.s32 (!%p219_p3), %v330_v5, %v332_v3  ;;  %vm1049_vm11 = vmor (!%p219_p3), %vm1048_vm8, %vm1045_vm7 }
   0xc   : > { %vm1052_vm12 = vmand (!%p219_p3), %vm1050_vm9, %vm1051_vm10 }
   0xd   : > { %vm1686_vm15 = vmor (!%p219_p3), %vm1052_vm12, %vm1049_vm11 }
   0xe   : > { %s1741_s18 = smov (!%p260_p4, %s1372_s18), 1  ;;  %vm1695_vm0 = vmand %vm1054_vm13, %vm1055_vm14 }
   0xf   : > { %s1194_s22 = sshll.u32 %s1741_s18, 4  ;;  %s1195_s23 = sshll.u32 %s1741_s18, 5  ;;  %vm1057_vm1 = vmor %vm1695_vm0, %vm1686_vm15 }
  0x10   : > { %s267_s26 = scalar_lea.vmem %s1726_s0, %s1194_s22  ;;  %s273_s29 = scalar_lea.vmem %s1727_s1, %s1195_s23 }
  0x11   : > { %v285_v9 = vld [vmem:[%s267_s26] sm:$0xff]  ;;  %v286_v10 = vld [vmem:[%s267_s26 + $0x8] sm:$0xff]  ;;  %v293_v17 = vld [vmem:[%s273_s29 + $0x10] sm:$0xff]  ;;  %s282_s15 = scalar_lea.vmem %s1731_s5, %s1194_s22 }
  0x12   : > { %v334_v12 = vrot.slane %v285_v9, %v1446_v8  ;;  %v344_v13 = vcombine.high %v286_v10, %v286_v10  ;;  %v327_v14 = vcombine.high %v285_v9, %v285_v9  ;;  %v351_v15 = vrot.slane %v286_v10, %v1446_v8  ;;  %v291_v16 = vld [vmem:[%s273_s29] sm:$0xff]  ;;  %v292_v21 = vld [vmem:[%s273_s29 + $0x8] sm:$0xff]  ;;  %307 = vperm.xlu1 %1225, %v293_v17   ;;  %v294_v24 = vld [vmem:[%s273_s29 + $0x18] sm:$0xff] }
  0x13   : > { %297 = vperm.xlu0 %1224, %v291_v16  }
  0x14   : > { %v342_v18 = vcombine.high %v334_v12, %v334_v12  ;;  %v341_v19 = vrot.slane %v327_v14, %v1446_v8  ;;  %v359_v20 = vcombine.high %v351_v15, %v351_v15  ;;  %v373_v22 = vand.u32 %v371_v11, %v334_v12 }
  0x15   : > { %v358_v23 = vrot.slane %v344_v13, %v1446_v8  ;;  %v385_v34 = vand.u32 %v371_v11, %v351_v15 }
  0x16   : > { %v376_v25 = vand.u32 %v371_v11, %v342_v18  ;;  %v343_v26 = vcombine.high %v341_v19, %v341_v19  ;;  %v388_v27 = vand.u32 %v371_v11, %v359_v20  ;;  %v379_v28 = vand.u32 %v371_v11, %v341_v19  ;;  %312 = vperm.xlu1 %1225, %v294_v24  }
  0x17   : > { %v360_v29 = vcombine.high %v358_v23, %v358_v23  ;;  %302 = vperm.xlu0 %1224, %v292_v21   ;;  %v391_v35 = vand.u32 %v371_v11, %v358_v23 }
  0x18   : > { %396 = vmatprep.subr.bf16.mxu0 %v376_v25  ;;  %v382_v30 = vand.u32 %v371_v11, %v343_v26 }
  0x19   : > { %397 = vmatpush1.bf16.msra.mxu0 %v373_v22  ;;  %v394_v33 = vand.u32 %v371_v11, %v360_v29 }
  0x1a   : > { %449 = vmatprep.subr.bf16.mxu1 %v382_v30  ;;  %502 = vmatprep.subr.bf16.mxu0 %v388_v27 }
  0x1b   : > { %450 = vmatpush1.bf16.msra.mxu1 %v379_v28  ;;  %820 = vperm.xlu0 %1224, %v817_v32  }
  0x1c   : > { %1176 = vmatmul.mubr.msk.bf16.vlgmr.msra.gmra.mrb[0].mxu0 %vm361_vm2, %v1228_v31  ;;  %555 = vmatprep.subr.bf16.mxu1 %v394_v33 }
  0x1d   : > { %503 = vmatpush1.bf16.msra.mxu0 %v385_v34  ;;  %438 = vmatprep.mubr.bf16.mxu0 %v1383_v4 }
  0x1e   : > { %1178 = vmatmul.mubr.msk.bf16.vlgmr.msra.gmra.mrb[0].mxu1 %vm361_vm2, %v1228_v31 }
  0x1f   : > { %556 = vmatpush1.bf16.msra.mxu1 %v391_v35  ;;  %491 = vmatprep.mubr.bf16.mxu1 %v1383_v4 }
  0x24   : > { %1177 = vmatmul.mubr.msk.bf16.gmra.mrb[4].mxu0 %vm361_vm2, %v1229_v36 }
  0x25   : > { %534 = vmatprep.mubr.bf16.mxu0 %v1383_v4 }
  0x26   : > { %1179 = vmatmul.mubr.msk.bf16.gmra.mrb[4].mxu1 %vm361_vm2, %v1229_v36 }
  0x27   : > { %587 = vmatprep.mubr.bf16.mxu1 %v1383_v4 }
  0x2c   : > { %1180 = vmatmul.mubr.msk.bf16.vlgmr.msra.gmra.mrb[8].mxu0 %vm361_vm2, %v1228_v31 }
  0x2d   : > { %544 = vmatprep.mubr.bf16.mxu0 %v1383_v4 }
  0x2e   : > { %1182 = vmatmul.mubr.msk.bf16.vlgmr.msra.gmra.mrb[8].mxu1 %vm361_vm2, %v1228_v31 }
  0x2f   : > { %597 = vmatprep.mubr.bf16.mxu1 %v1383_v4 }
  0x34   : > { %1181 = vmatmul.mubr.msk.bf16.gmra.mrb[12].mxu0 %vm361_vm2, %v1229_v36 }
  0x35   : > { %859 = vmatprep.mubr.bf16.mxu0 %v1383_v4 }
  0x36   : > { %1183 = vmatmul.mubr.msk.bf16.gmra.mrb[12].mxu1 %vm361_vm2, %v1229_v36 }
  0x37   : > { %900 = vmatprep.mubr.bf16.mxu1 %v1383_v4 }
  0x91   : > { %v1488_v42 = vpop.permute.xlu1 %307 }
  0x92   : > { %v1481_v37 = vpop.permute.xlu0 %297 }
  0x95   : > { %v1519_v9 = vpop.permute.xlu1 %312 }
  0x96   : > { %v1483_v39 = vpop.permute.xlu0 %302 }
  0xef   : > { %v430_v38 = vpop.f32.mrb[0].mxu0 }
  0xf0   : > { %v1486_v40 = vadd.f32 %v430_v38, %v1481_v37  ;;  %v432_v41 = vpop.f32.mrb[1].mxu0 }
  0xf1   : > { %v1491_v43 = vadd.f32 %v432_v41, %v1481_v37  ;;  %v434_v44 = vpop.f32.mrb[2].mxu0  ;;  %v483_v45 = vpop.f32.mrb[0].mxu1 }
  0xf2   : > { %v608_v46 = vsub.f32 0.0, %v1486_v40  ;;  %v1495_v47 = vadd.f32 %v434_v44, %v1483_v39  ;;  %v1498_v48 = vadd.f32 %v483_v45, %v1481_v37  ;;  %v436_v49 = vpop.f32.mrb[3].mxu0  ;;  %v485_v50 = vpop.f32.mrb[1].mxu1 }
  0xf3   : > { %v609_v51 = vsub.f32 0.0, %v1491_v43  ;;  %v1502_v52 = vadd.f32 %v436_v49, %v1483_v39  ;;  %v1505_v53 = vadd.f32 %v485_v50, %v1481_v37  ;;  %v487_v54 = vpop.f32.mrb[2].mxu1 }
  0xf4   : > { %v640_v55 = vmul.f32 1.442695, %v608_v46  ;;  %v616_v56 = vsub.f32 0.0, %v1495_v47  ;;  %v610_v57 = vsub.f32 0.0, %v1498_v48  ;;  %v1510_v58 = vadd.f32 %v487_v54, %v1483_v39  ;;  %v489_v59 = vpop.f32.mrb[3].mxu1 }
  0xf5   : > { %v642_v60 = vmul.f32 1.442695, %v609_v51  ;;  %v617_v61 = vsub.f32 0.0, %v1502_v52  ;;  %v611_v62 = vsub.f32 0.0, %v1505_v53  ;;  %v1515_v63 = vadd.f32 %v489_v59, %v1483_v39 }
  0xf6   : > { %1230 = vpow2.f32 %v640_v55  ;;  %v656_v0 = vmul.f32 1.442695, %v616_v56  ;;  %v644_v1 = vmul.f32 1.442695, %v610_v57  ;;  %v618_v2 = vsub.f32 0.0, %v1510_v58 }
  0xf7   : > { %1232 = vpow2.f32 %v642_v60  ;;  %v658_v3 = vmul.f32 1.442695, %v617_v61  ;;  %v646_v5 = vmul.f32 1.442695, %v611_v62  ;;  %v619_v6 = vsub.f32 0.0, %v1515_v63  ;;  %v440_v7 = vpop.f32.mrb[4].mxu0 }
  0xf8   : > { %1234 = vpow2.f32 %v656_v0  ;;  %v660_v10 = vmul.f32 1.442695, %v618_v2  ;;  %v1522_v11 = vadd.f32 %v440_v7, %v1488_v42  ;;  %v442_v12 = vpop.f32.mrb[5].mxu0 }
  0xf9   : > { %1236 = vpow2.f32 %v644_v1  ;;  %v662_v13 = vmul.f32 1.442695, %v619_v6  ;;  %v1525_v14 = vadd.f32 %v442_v12, %v1488_v42  ;;  %v444_v15 = vpop.f32.mrb[6].mxu0  ;;  %v493_v16 = vpop.f32.mrb[4].mxu1 }
  0xfa   : > { %1238 = vpow2.f32 %v658_v3  ;;  %v624_v17 = vsub.f32 0.0, %v1522_v11  ;;  %v1529_v18 = vadd.f32 %v444_v15, %v1519_v9  ;;  %v1532_v19 = vadd.f32 %v493_v16, %v1488_v42  ;;  %v446_v20 = vpop.f32.mrb[7].mxu0  ;;  %v495_v21 = vpop.f32.mrb[5].mxu1 }
  0xfb   : > { %1240 = vpow2.f32 %v646_v5  ;;  %v625_v22 = vsub.f32 0.0, %v1525_v14  ;;  %v1536_v23 = vadd.f32 %v446_v20, %v1519_v9  ;;  %v497_v24 = vpop.f32.mrb[6].mxu1  ;;  %v1542_v34 = vadd.f32 %v495_v21, %v1488_v42 }
  0xfc   : > { %1242 = vpow2.f32 %v660_v10  ;;  %v672_v25 = vmul.f32 1.442695, %v624_v17  ;;  %v632_v26 = vsub.f32 0.0, %v1529_v18  ;;  %v626_v27 = vsub.f32 0.0, %v1532_v19  ;;  %v499_v28 = vpop.f32.mrb[7].mxu1 }
  0xfd   : > { %1244 = vpow2.f32 %v662_v13  ;;  %v674_v29 = vmul.f32 1.442695, %v625_v22  ;;  %v633_v30 = vsub.f32 0.0, %v1536_v23  ;;  %v1545_v45 = vadd.f32 %v497_v24, %v1519_v9 }
  0xfe   : > { %1246 = vpow2.f32 %v672_v25  ;;  %v688_v31 = vmul.f32 1.442695, %v632_v26  ;;  %v676_v32 = vmul.f32 1.442695, %v626_v27  ;;  %v627_v59 = vsub.f32 0.0, %v1542_v34 }
  0xff   : > { %1248 = vpow2.f32 %v674_v29  ;;  %v690_v33 = vmul.f32 1.442695, %v633_v30  ;;  %v536_v35 = vpop.f32.mrb[8].mxu0  ;;  %v1549_v0 = vadd.f32 %v499_v28, %v1519_v9  ;;  %v634_v6 = vsub.f32 0.0, %v1545_v45 }
 0x100   : > { %v1231_v36 = vpop.eup %1230  ;;  %1250 = vpow2.f32 %v688_v31  ;;  %v538_v38 = vpop.f32.mrb[9].mxu0  ;;  %v1552_v1 = vadd.f32 %v536_v35, %v1481_v37  ;;  %v678_v16 = vmul.f32 1.442695, %v627_v59 }
 0x101   : > { %v1233_v41 = vpop.eup %1232  ;;  %v704_v44 = vadd.f32 1.0, %v1231_v36  ;;  %1252 = vpow2.f32 %v676_v32  ;;  %v540_v46 = vpop.f32.mrb[10].mxu0  ;;  %v1556_v12 = vadd.f32 %v538_v38, %v1481_v37  ;;  %v635_v22 = vsub.f32 0.0, %v1549_v0 }
 0x102   : > { %v589_v49 = vpop.f32.mrb[8].mxu1  ;;  %v1235_v50 = vpop.eup %1234  ;;  %v705_v51 = vadd.f32 1.0, %v1233_v41  ;;  %1254 = vpow2.f32 %v690_v33  ;;  %v612_v24 = vsub.f32 0.0, %v1552_v1  ;;  %v692_v28 = vmul.f32 1.442695, %v634_v6 }
 0x103   : > { %v542_v54 = vpop.f32.mrb[11].mxu0  ;;  %v591_v55 = vpop.f32.mrb[9].mxu1  ;;  %1256 = vrcp.f32 %v704_v44  ;;  %v712_v57 = vadd.f32 1.0, %v1235_v50  ;;  %v1561_v29 = vadd.f32 %v540_v46, %v1483_v39  ;;  %v613_v35 = vsub.f32 0.0, %v1556_v12 }
 0x104   : > { %v1237_v56 = vpop.eup %1236  ;;  %v593_v60 = vpop.f32.mrb[10].mxu1  ;;  %1258 = vrcp.f32 %v705_v51  ;;  %v1569_v36 = vadd.f32 %v589_v49, %v1481_v37  ;;  %v1576_v50 = vadd.f32 %v542_v54, %v1483_v39  ;;  %v1579_v51 = vadd.f32 %v591_v55, %v1481_v37 }
 0x105   : > { %v1239_v61 = vpop.eup %1238  ;;  %v706_v62 = vadd.f32 1.0, %v1237_v56  ;;  %v595_v2 = vpop.f32.mrb[11].mxu1  ;;  %1260 = vrcp.f32 %v712_v57  ;;  %v694_v49 = vmul.f32 1.442695, %v635_v22  ;;  %v620_v6 = vsub.f32 0.0, %v1561_v29 }
 0x106   : > { %v1241_v3 = vpop.eup %1240  ;;  %v713_v5 = vadd.f32 1.0, %v1239_v61  ;;  %v648_v61 = vmul.f32 1.442695, %v612_v24  ;;  %v1587_v54 = vadd.f32 %v593_v60, %v1483_v39  ;;  %v650_v37 = vmul.f32 1.442695, %v613_v35 }
 0x107   : > { %v1243_v7 = vpop.eup %1242  ;;  %1262 = vrcp.f32 %v706_v62  ;;  %v707_v10 = vadd.f32 1.0, %v1241_v3  ;;  %v546_v17 = vpop.f32.mrb[12].mxu0  ;;  %v614_v55 = vsub.f32 0.0, %v1569_v36 }
 0x108   : > { %v1245_v13 = vpop.eup %1244  ;;  %1264 = vrcp.f32 %v713_v5  ;;  %v714_v15 = vadd.f32 1.0, %v1243_v7  ;;  %v548_v25 = vpop.f32.mrb[13].mxu0 }
 0x109   : > { %v1247_v20 = vpop.eup %1246  ;;  %1266 = vrcp.f32 %v707_v10  ;;  %v715_v21 = vadd.f32 1.0, %v1245_v13  ;;  %v1563_v30 = vpop.f32.mrb[14].mxu0  ;;  %v1591_v10 = vadd.f32 %v595_v2, %v1483_v39  ;;  %v664_v2 = vmul.f32 1.442695, %v620_v6 }
 0x10a   : > { %v1249_v26 = vpop.eup %1248  ;;  %1268 = vrcp.f32 %v714_v15  ;;  %v720_v27 = vadd.f32 1.0, %v1247_v20  ;;  %v1565_v31 = vpop.f32.mrb[12].mxu1  ;;  %v621_v15 = vsub.f32 0.0, %v1576_v50  ;;  %v615_v20 = vsub.f32 0.0, %v1579_v51 }
 0x10b   : > { %v1251_v32 = vpop.eup %1250  ;;  %1270 = vrcp.f32 %v715_v21  ;;  %v721_v33 = vadd.f32 1.0, %v1249_v26  ;;  %v1571_v38 = vpop.f32.mrb[15].mxu0  ;;  %v1596_v21 = vadd.f32 %v546_v17, %v1488_v42  ;;  %v1601_v26 = vadd.f32 %v548_v25, %v1488_v42 }
 0x10c   : > { %v1573_v41 = vpop.f32.mrb[13].mxu1  ;;  %v1253_v44 = vpop.eup %1252  ;;  %1272 = vrcp.f32 %v720_v27  ;;  %v728_v46 = vadd.f32 1.0, %v1251_v32  ;;  %v622_v27 = vsub.f32 0.0, %v1587_v54  ;;  %v652_v35 = vmul.f32 1.442695, %v614_v55 }
 0x10d   : > { %v1581_v56 = vpop.f32.mrb[14].mxu1  ;;  %v1255_v57 = vpop.eup %1254  ;;  %1274 = vrcp.f32 %v721_v33  ;;  %v722_v59 = vadd.f32 1.0, %v1253_v44  ;;  %v623_v17 = vsub.f32 0.0, %v1591_v10 }
 0x10e   : > { %v1583_v62 = vpop.f32.mrb[15].mxu1  ;;  %v1257_v3 = vpop.eup %1256  ;;  %1276 = vrcp.f32 %v728_v46  ;;  %v729_v5 = vadd.f32 1.0, %v1255_v57  ;;  %v654_v46 = vmul.f32 1.442695, %v615_v20  ;;  %v629_v57 = vsub.f32 0.0, %v1601_v26 }
 0x10f   : > { %v1259_v7 = vpop.eup %1258  ;;  %1278 = vrcp.f32 %v722_v59  ;;  %v768_v60 = vmul.f32 %v1257_v3, %v1486_v40  ;;  %v666_v40 = vmul.f32 1.442695, %v621_v15  ;;  %v668_v3 = vmul.f32 1.442695, %v622_v27 }
 0x110   : > { %v1261_v13 = vpop.eup %1260  ;;  %1280 = vrcp.f32 %v729_v5 }
 0x111   : > { %v1263_v22 = vpop.eup %1262  ;;  %v776_v24 = vmul.f32 %v1261_v13, %v1495_v47  ;;  %1282 = vpow2.f32 %v678_v16  ;;  %v628_v47 = vsub.f32 0.0, %v1596_v21  ;;  %v769_v13 = vmul.f32 %v1259_v7, %v1491_v43 }
 0x112   : > { %v1265_v39 = vpop.eup %1264  ;;  %1284 = vpow2.f32 %v692_v28  ;;  %v770_v25 = vmul.f32 %v1263_v22, %v1498_v48 }
 0x113   : > { %v1267_v32 = vpop.eup %1266  ;;  %v801_v33 = vpack.c.bf16 %v776_v24, %v768_v60  ;;  %1286 = vpow2.f32 %v694_v49  ;;  %v777_v49 = vmul.f32 %v1265_v39, %v1502_v52  ;;  %v680_v48 = vmul.f32 1.442695, %v628_v47 }
 0x114   : > { %v1269_v44 = vpop.eup %1268  ;;  %1288 = vpow2.f32 %v648_v61  ;;  %v670_v61 = vmul.f32 1.442695, %v623_v17  ;;  %v682_v52 = vmul.f32 1.442695, %v629_v57  ;;  %v771_v60 = vmul.f32 %v1267_v32, %v1505_v53 }
 0x115   : > { %v1271_v16 = vpop.eup %1270  ;;  %v778_v28 = vmul.f32 %v1269_v44, %v1510_v58  ;;  %1290 = vpow2.f32 %v650_v37  ;;  %v802_v24 = vpack.c.bf16 %v777_v49, %v769_v13 }
 0x116   : > { %v1273_v59 = vpop.eup %1272  ;;  %1292 = vpow2.f32 %v664_v2  ;;  %v779_v15 = vmul.f32 %v1271_v16, %v1515_v63 }
 0x117   : > { %v1275_v5 = vpop.eup %1274  ;;  %v803_v6 = vpack.c.bf16 %v778_v28, %v770_v25  ;;  %1294 = vpow2.f32 %v652_v35  ;;  %v784_v37 = vmul.f32 %v1273_v59, %v1522_v11  ;;  %827 = vmatprep.subr.bf16.mxu0 %v802_v24  ;;  %v1629_v25 = vadd.f32 %v1571_v38, %v1519_v9 }
 0x118   : > { %v1277_v55 = vpop.eup %1276  ;;  %1296 = vpow2.f32 %v666_v40  ;;  %v785_v43 = vmul.f32 %v1275_v5, %v1525_v14  ;;  %v804_v11 = vpack.c.bf16 %v779_v15, %v771_v60  ;;  %828 = vmatpush1.bf16.msra.mxu0 %v801_v33  ;;  %v1625_v33 = vadd.f32 %v1565_v31, %v1488_v42 }
 0x119   : > { %v1612_v58 = vpop.eup %1278  ;;  %v792_v20 = vmul.f32 %v1277_v55, %v1529_v18  ;;  %1298 = vpow2.f32 %v654_v46  ;;  %v1638_v31 = vadd.f32 %v1573_v41, %v1488_v42  ;;  %v1648_v55 = vadd.f32 %v1583_v62, %v1519_v9 }
 0x11a   : > { %v1281_v22 = vpop.eup %1280  ;;  %1300 = vpow2.f32 %v668_v3  ;;  %868 = vmatprep.subr.bf16.mxu1 %v804_v11  ;;  %v1643_v3 = vadd.f32 %v1581_v56, %v1519_v9  ;;  %v637_v13 = vsub.f32 0.0, %v1629_v25 }
 0x11b   : > { %v1283_v39 = vpop.eup %1282  ;;  %v809_v7 = vpack.c.bf16 %v792_v20, %v784_v37  ;;  %v793_v63 = vmul.f32 %v1281_v22, %v1536_v23  ;;  %1302 = vpow2.f32 %v670_v61  ;;  %v1621_v23 = vadd.f32 %v1563_v30, %v1519_v9  ;;  %869 = vmatpush1.bf16.msra.mxu1 %v803_v6  ;;  %v1634_v30 = vld [vmem:[%s1729_s3] sm:$0x3] }
 0x11c   : > { %v1285_v2 = vpop.eup %1284  ;;  %v723_v27 = vadd.f32 1.0, %v1283_v39  ;;  %1304 = vpow2.f32 %v680_v48  ;;  %v630_v61 = vsub.f32 0.0, %v1625_v33  ;;  %v631_v48 = vsub.f32 0.0, %v1638_v31 }
 0x11d   : > { %v1287_v18 = vpop.eup %1286  ;;  %v730_v35 = vadd.f32 1.0, %v1285_v2  ;;  %1306 = vpow2.f32 %v682_v52  ;;  %v810_v17 = vpack.c.bf16 %v793_v63, %v785_v43  ;;  %v636_v38 = vsub.f32 0.0, %v1621_v23 }
 0x11e   : > { %v1289_v53 = vpop.eup %1288  ;;  %1308 = vrcp.f32 %v723_v27  ;;  %v731_v32 = vadd.f32 1.0, %v1287_v18  ;;  %v638_v9 = vsub.f32 0.0, %v1643_v3  ;;  %v684_v52 = vmul.f32 1.442695, %v630_v61 }
 0x11f   : > { %v1291_v44 = vpop.eup %1290  ;;  %1310 = vrcp.f32 %v730_v35  ;;  %v708_v14 = vadd.f32 1.0, %v1289_v53  ;;  %829 = vmatprep.subr.bf16.mxu0 %v810_v17  ;;  %v696_v20 = vmul.f32 1.442695, %v636_v38  ;;  %v639_v22 = vsub.f32 0.0, %v1648_v55 }
 0x120   : > { %v1293_v40 = vpop.eup %1292  ;;  %1312 = vrcp.f32 %v731_v32  ;;  %v709_v46 = vadd.f32 1.0, %v1291_v44  ;;  %830 = vmatpush1.bf16.msra.mxu0 %v809_v7  ;;  %v698_v24 = vmul.f32 1.442695, %v637_v13  ;;  %v786_v43 = vmul.f32 %v1612_v58, %v1532_v19 }
 0x121   : > { %v1295_v47 = vpop.eup %1294  ;;  %1314 = vrcp.f32 %v708_v14  ;;  %v716_v16 = vadd.f32 1.0, %v1293_v40  ;;  %v686_v63 = vmul.f32 1.442695, %v631_v48  ;;  %v700_v18 = vmul.f32 1.442695, %v638_v9 }
 0x122   : > { %v1297_v28 = vpop.eup %1296  ;;  %1316 = vrcp.f32 %v709_v46  ;;  %v710_v57 = vadd.f32 1.0, %v1295_v47  ;;  %v702_v53 = vmul.f32 1.442695, %v639_v22 }
 0x123   : > { %v1299_v59 = vpop.eup %1298  ;;  %1318 = vrcp.f32 %v716_v16  ;;  %v717_v49 = vadd.f32 1.0, %v1297_v28  ;;  %1184 = vmatmul.mubr.msk.bf16.vlgmr.msra.gmra.mrb[16].mxu0 %vm823_vm3, %v1634_v30 }
 0x124   : > { %v1301_v5 = vpop.eup %1300  ;;  %1320 = vrcp.f32 %v710_v57  ;;  %v711_v6 = vadd.f32 1.0, %v1299_v59  ;;  %941 = vmatprep.mubr.bf16.mxu0 %v1383_v4 }
 0x125   : > { %v1303_v42 = vpop.eup %1302  ;;  %1322 = vrcp.f32 %v717_v49  ;;  %v718_v41 = vadd.f32 1.0, %v1301_v5 }
 0x126   : > { %v1305_v56 = vpop.eup %1304  ;;  %1324 = vrcp.f32 %v711_v6  ;;  %v719_v15 = vadd.f32 1.0, %v1303_v42 }
 0x127   : > { %v1307_v37 = vpop.eup %1306  ;;  %1326 = vrcp.f32 %v718_v41  ;;  %v724_v57 = vadd.f32 1.0, %v1305_v56 }
 0x128   : > { %v1309_v62 = vpop.eup %1308  ;;  %1328 = vrcp.f32 %v719_v15  ;;  %v725_v38 = vadd.f32 1.0, %v1307_v37 }
 0x129   : > { %v1311_v60 = vpop.eup %1310  ;;  %v787_v27 = vmul.f32 %v1309_v62, %v1542_v34  ;;  %1330 = vpow2.f32 %v696_v20 }
 0x12a   : > { %v1313_v39 = vpop.eup %1312  ;;  %v794_v7 = vmul.f32 %v1311_v60, %v1545_v45  ;;  %1332 = vpow2.f32 %v684_v52 }
 0x12b   : > { %v1315_v2 = vpop.eup %1314  ;;  %v795_v11 = vmul.f32 %v1313_v39, %v1549_v0  ;;  %1334 = vpow2.f32 %v698_v24 }
 0x12c   : > { %v1317_v35 = vpop.eup %1316  ;;  %v811_v17 = vpack.c.bf16 %v794_v7, %v786_v43  ;;  %v772_v19 = vmul.f32 %v1315_v2, %v1552_v1  ;;  %1336 = vpow2.f32 %v686_v63 }
 0x12d   : > { %v1319_v32 = vpop.eup %1318  ;;  %v812_v44 = vpack.c.bf16 %v795_v11, %v787_v27  ;;  %1338 = vpow2.f32 %v700_v18  ;;  %v773_v0 = vmul.f32 %v1317_v35, %v1556_v12 }
 0x12e   : > { %v1321_v14 = vpop.eup %1320  ;;  %v780_v45 = vmul.f32 %v1319_v32, %v1561_v29  ;;  %1340 = vpow2.f32 %v702_v53 }
 0x12f   : > { %v1323_v58 = vpop.eup %1322  ;;  %870 = vmatprep.subr.bf16.mxu1 %v812_v44  ;;  %v774_v28 = vmul.f32 %v1321_v14, %v1569_v36  ;;  %1342 = vrcp.f32 %v724_v57 }
 0x130   : > { %v1325_v34 = vpop.eup %1324  ;;  %v805_v40 = vpack.c.bf16 %v780_v45, %v772_v19  ;;  %v781_v46 = vmul.f32 %v1323_v58, %v1576_v50  ;;  %871 = vmatpush1.bf16.msra.mxu1 %v811_v17  ;;  %1344 = vrcp.f32 %v725_v38 }
 0x131   : > { %v1327_v47 = vpop.eup %1326  ;;  %v775_v59 = vmul.f32 %v1325_v34, %v1579_v51 }
 0x132   : > { %v1329_v16 = vpop.eup %1328  ;;  %v782_v1 = vmul.f32 %v1327_v47, %v1587_v54  ;;  %v806_v29 = vpack.c.bf16 %v781_v46, %v773_v0  ;;  %v1058_v46 = vld [vmem:[%s282_s15] sm:$0xff] }
 0x133   : > { %v783_v49 = vmul.f32 %v1329_v16, %v1591_v10  ;;  %1185 = vmatmul.mubr.msk.bf16.vlgmr.msra.gmra.mrb[16].mxu1 %vm823_vm3, %v1634_v30  ;;  %v1331_v50 = vpop.eup %1330 }
 0x134   : > { %v807_v12 = vpack.c.bf16 %v782_v1, %v774_v28  ;;  %909 = vmatprep.subr.bf16.mxu0 %v806_v29  ;;  %982 = vmatprep.mubr.bf16.mxu1 %v1383_v4  ;;  %v1333_v36 = vpop.eup %1332  ;;  %v732_v54 = vadd.f32 1.0, %v1331_v50 }
 0x135   : > { %910 = vmatpush1.bf16.msra.mxu0 %v805_v40  ;;  %v808_v5 = vpack.c.bf16 %v783_v49, %v775_v59  ;;  %v1335_v6 = vpop.eup %1334  ;;  %v726_v61 = vadd.f32 1.0, %v1333_v36 }
 0x136   : > { %v1337_v51 = vpop.eup %1336  ;;  %1346 = vrcp.f32 %v732_v54  ;;  %v733_v10 = vadd.f32 1.0, %v1335_v6 }
 0x137   : > { %950 = vmatprep.subr.bf16.mxu1 %v808_v5  ;;  %v1339_v42 = vpop.eup %1338  ;;  %1348 = vrcp.f32 %v726_v61  ;;  %v727_v41 = vadd.f32 1.0, %v1337_v51 }
 0x138   : > { %951 = vmatpush1.bf16.msra.mxu1 %v807_v12  ;;  %v1341_v13 = vpop.eup %1340  ;;  %1350 = vrcp.f32 %v733_v10  ;;  %v734_v4 = vadd.f32 1.0, %v1339_v42  ;;  %v1061_v42 = vld [vmem:[%s282_s15 + $0x8] sm:$0xff] }
 0x139   : > { %1352 = vrcp.f32 %v727_v41  ;;  %v735_v56 = vadd.f32 1.0, %v1341_v13  ;;  %v1343_v15 = vpop.eup %1342 }
 0x13a   : > { %1354 = vrcp.f32 %v734_v4  ;;  %v1345_v48 = vpop.eup %1344  ;;  %v788_v9 = vmul.f32 %v1343_v15, %v1596_v21 }
 0x13b   : > { %1356 = vrcp.f32 %v735_v56  ;;  %v789_v60 = vmul.f32 %v1345_v48, %v1601_v26  ;;  %v821_v26 = vpop.permute.xlu0 %820 }
 0x140   : > { %v1347_v37 = vpop.eup %1346 }
 0x141   : > { %v1349_v20 = vpop.eup %1348  ;;  %v796_v62 = vmul.f32 %v1347_v37, %v1621_v23 }
 0x142   : > { %v1351_v52 = vpop.eup %1350  ;;  %v790_v63 = vmul.f32 %v1349_v20, %v1625_v33 }
 0x143   : > { %v1353_v22 = vpop.eup %1352  ;;  %v813_v24 = vpack.c.bf16 %v796_v62, %v788_v9  ;;  %v797_v39 = vmul.f32 %v1351_v52, %v1629_v25 }
 0x144   : > { %v1355_v43 = vpop.eup %1354  ;;  %v791_v11 = vmul.f32 %v1353_v22, %v1638_v31 }
 0x145   : > { %v1357_v7 = vpop.eup %1356  ;;  %v798_v2 = vmul.f32 %v1355_v43, %v1643_v3  ;;  %v814_v27 = vpack.c.bf16 %v797_v39, %v789_v60 }
 0x146   : > { %v799_v21 = vmul.f32 %v1357_v7, %v1648_v55 }
 0x147   : > { %v815_v18 = vpack.c.bf16 %v798_v2, %v790_v63  ;;  %911 = vmatprep.subr.bf16.mxu0 %v814_v27 }
 0x148   : > { %912 = vmatpush1.bf16.msra.mxu0 %v813_v24  ;;  %v816_v23 = vpack.c.bf16 %v799_v21, %v791_v11 }
 0x14a   : > { %952 = vmatprep.subr.bf16.mxu1 %v816_v23 }
 0x14b   : > { %953 = vmatpush1.bf16.msra.mxu1 %v815_v18  ;;  %1186 = vmatmul.mubr.msk.bf16.vlgmr.msra.gmra.mrb[20].mxu0 %vm823_vm3, %v1634_v30 }
 0x14e   : > { %1187 = vmatmul.mubr.msk.bf16.vlgmr.msra.gmra.mrb[20].mxu1 %vm823_vm3, %v1634_v30 }
 0x1f6   : > { %v861_v33 = vpop.f32.mrb[16].mxu0 }
 0x1f7   : > { %v862_v25 = vadd.f32 %v861_v33, %v821_v26  ;;  %v863_v3 = vpop.f32.mrb[17].mxu0 }
 0x1f8   : > { %v864_v35 = vadd.f32 %v863_v3, %v821_v26  ;;  %v865_v31 = vpop.f32.mrb[18].mxu0 }
 0x1f9   : > { %v866_v17 = vpop.f32.mrb[19].mxu0 }
 0x1fa   : > { %v1188_v55 = vpack.c.bf16 %v864_v35, %v862_v25 }
 0x1fc   : > { %v1015_v0 = vrot.slane %v1188_v55, %v1446_v8 }
 0x206   : > { %v902_v53 = vpop.f32.mrb[16].mxu1 }
 0x207   : > { %v903_v30 = vadd.f32 %v902_v53, %v821_v26  ;;  %v904_v32 = vpop.f32.mrb[17].mxu1 }
 0x208   : > { %v905_v44 = vadd.f32 %v904_v32, %v821_v26  ;;  %v906_v14 = vpop.f32.mrb[18].mxu1 }
 0x209   : > { %v907_v45 = vpop.f32.mrb[19].mxu1 }
 0x20a   : > { %v1189_v58 = vpack.c.bf16 %v905_v44, %v903_v30 }
 0x20c   : > { %v1022_v40 = vrot.slane %v1189_v58, %v1446_v8 }
 0x20e   : > { %v1023_v47 = vcombine.low %v1015_v0, %v1022_v40 }
 0x210   : > { %v1059_v16 = vsel %vm1057_vm1, %v1023_v47, %v1058_v46 }
 0x211   : > { %1060 = vst [vmem:[%s282_s15] sm:$0xff] %v1059_v16 }
 0x21e   : > { %v943_v28 = vpop.f32.mrb[20].mxu0 }
 0x21f   : > { %v944_v1 = vadd.f32 %v943_v28, %v821_v26  ;;  %v945_v57 = vpop.f32.mrb[21].mxu0 }
 0x220   : > { %v946_v29 = vadd.f32 %v945_v57, %v821_v26  ;;  %v947_v59 = vpop.f32.mrb[22].mxu0 }
 0x221   : > { %v984_v49 = vpop.f32.mrb[20].mxu1  ;;  %v948_v38 = vpop.f32.mrb[23].mxu0 }
 0x222   : > { %v1190_v12 = vpack.c.bf16 %v946_v29, %v944_v1  ;;  %v985_v50 = vadd.f32 %v984_v49, %v821_v26  ;;  %v986_v5 = vpop.f32.mrb[21].mxu1 }
 0x223   : > { %v987_v36 = vadd.f32 %v986_v5, %v821_v26  ;;  %v988_v54 = vpop.f32.mrb[22].mxu1 }
 0x224   : > { %v989_v6 = vpop.f32.mrb[23].mxu1  ;;  %v1032_v51 = vrot.slane %v1190_v12, %v1446_v8 }
 0x225   : > { %v1191_v61 = vpack.c.bf16 %v987_v36, %v985_v50 }
 0x227   : > { %v1039_v10 = vrot.slane %v1191_v61, %v1446_v8 }
 0x229   : > { %v1040_v41 = vcombine.low %v1032_v51, %v1039_v10 }
 0x22b   : > { %v1062_v13 = vsel %vm1057_vm1, %v1040_v41, %v1061_v42 }
 0x22c   : > { %1063 = vst [vmem:[%s282_s15 + $0x8] sm:$0xff] %v1062_v13 }
 0x22d PF: > { %s15_s20 = sadd.s32 1, %s1380_s20   ;;  %s1736_s18 = smov %s1376_s19 }
 0x22e   : > { %p12_p5 = scmp.ge.s32.totalorder %s15_s20, 4   ;;  %s1737_s19 = smov %s1739_s21 }
 0x230   :  { %14 = sbr.rel (!%p12_p5) target bundleno = 2 (0x2), region = 73 }

</bundles_post_ra>
